<compile_context>
chip_gen: v7x
topology: tpu7x:2x2x1
jax: 0.10.0
libtpu: 0.0.40
codegen_flags: <defaults>
</compile_context>

<pallas_src>
from functools import partial

import jax
import jax.numpy as jnp
from jax.experimental import pallas as pl
from jax.experimental.pallas import tpu as pltpu

EPS = 1e-5
VMEM_LIMIT_BYTES = 64 * 1024 * 1024     # safe limit on v5e/v6e (128 MiB) and v7x (64 MiB)
TILED_VMEM_BUDGET = 24 * 1024 * 1024    # per-grid-step working-set target (tiled path)
FUSED_VMEM_BUDGET = 20 * 1024 * 1024    # whole-problem threshold for the fused path
MAX_STRIP = 128 * 1024                  # absolute spatial-strip cap (elements)


def _pick_strip(hw, per_elem_bytes, max_strip=None):
    """Largest spatial strip under the VMEM budget (multiple of 128), or full hw."""
    cap = MAX_STRIP if max_strip is None else max_strip
    max_elems = min(cap, TILED_VMEM_BUDGET // max(per_elem_bytes, 1))
    max_elems = max(128, (max_elems // 128) * 128)
    if hw <= max_elems:
        return hw                       # full extent: always a legal block, no masking
    return max_elems


# ==========================================================================
# Fused single-invocation path (whole working set resident in VMEM).
# ==========================================================================
def _fused_kernel(g_ref, x_ref, wg_ref, wx_ref, wpsi_ref,
                  gamg_ref, betg_ref, gamx_ref, betx_ref, gamp_ref, betp_ref,
                  o_ref, z_ref):
    nb, _, hw = g_ref.shape
    cnt = float(nb * hw)
    wg = wg_ref[...]
    wx = wx_ref[...]
    wpsi = wpsi_ref[...]
    f_int = wg.shape[0]

    def affine(s, q, gamma, beta):
        mean = s / cnt
        # NOTE: E[y^2]-E[y]^2 in f32; clamp guards tiny negative cancellation.
        var = jnp.maximum(q / cnt - mean * mean, 0.0)
        scale = gamma * jax.lax.rsqrt(var + EPS)
        return scale, beta - mean * scale

    # --- sweep 1: branch pre-BN statistics -------------------------------
    sg = jnp.zeros((f_int, 1), jnp.float32)
    qg = jnp.zeros((f_int, 1), jnp.float32)
    sx = jnp.zeros((f_int, 1), jnp.float32)
    qx = jnp.zeros((f_int, 1), jnp.float32)
    for n in range(nb):
        yg = jnp.dot(wg, g_ref[n], preferred_element_type=jnp.float32)
        yx = jnp.dot(wx, x_ref[n], preferred_element_type=jnp.float32)
        sg = sg + jnp.sum(yg, axis=1, keepdims=True)
        qg = qg + jnp.sum(yg * yg, axis=1, keepdims=True)
        sx = sx + jnp.sum(yx, axis=1, keepdims=True)
        qx = qx + jnp.sum(yx * yx, axis=1, keepdims=True)

    scale_g, shift_g = affine(sg, qg, gamg_ref[...], betg_ref[...])
    scale_x, shift_x = affine(sx, qx, gamx_ref[...], betx_ref[...])
    wg_eff = wg * scale_g                    # fold BN scale into conv weights
    wx_eff = wx * scale_x
    shift = shift_g + shift_x                # (F_int, 1)

    # --- sweep 2: a = ReLU(BN(conv g) + BN(conv x)); z = conv_psi(a) ------
    zs = jnp.zeros((1, 1), jnp.float32)
    zq = jnp.zeros((1, 1), jnp.float32)
    for n in range(nb):
        a = jnp.dot(wg_eff, g_ref[n], preferred_element_type=jnp.float32)
        a = a + jnp.dot(wx_eff, x_ref[n], preferred_element_type=jnp.float32)
        a = jnp.maximum(a + shift, 0.0)
        z = jnp.dot(wpsi, a, preferred_element_type=jnp.float32)       # (1, HW)
        z_ref[n] = z
        zs = zs + jnp.sum(z, axis=1, keepdims=True)
        zq = zq + jnp.sum(z * z, axis=1, keepdims=True)

    scale_p, shift_p = affine(zs, zq, gamp_ref[...], betp_ref[...])

    # --- sweep 3: psi = sigmoid(BN(z)); out = x * psi ---------------------
    for n in range(nb):
        t = z_ref[n] * scale_p + shift_p
        p = 1.0 / (1.0 + jnp.exp(-t))
        o_ref[n] = x_ref[n] * p


# ==========================================================================
# Tiled 3-pass path.
# ==========================================================================
def _moments_kernel(g_ref, x_ref, sg_ref, gg_ref, sx_ref, gx_ref, *, hw, masked):
    """Pass 1: per-batch raw-input channel sums and Gram matrices."""
    s = pl.program_id(1)

    @pl.when(s == 0)
    def _():
        sg_ref[...] = jnp.zeros_like(sg_ref)
        gg_ref[...] = jnp.zeros_like(gg_ref)
        sx_ref[...] = jnp.zeros_like(sx_ref)
        gx_ref[...] = jnp.zeros_like(gx_ref)

    gt = g_ref[0]                                    # (F_g, strip)
    xt = x_ref[0]                                    # (F_l, strip)
    if masked:
        strip = gt.shape[1]
        col = jax.lax.broadcasted_iota(jnp.int32, (1, strip), 1)
        valid = (col + s * strip) < hw
        gt = jnp.where(valid, gt, 0.0)
        xt = jnp.where(valid, xt, 0.0)

    nt = (((1,), (1,)), ((), ()))                    # contract minor dims: A @ A^T
    sg_ref[0] += jnp.sum(gt, axis=1, keepdims=True)
    gg_ref[0] += jax.lax.dot_general(gt, gt, nt, preferred_element_type=jnp.float32)
    sx_ref[0] += jnp.sum(xt, axis=1, keepdims=True)
    gx_ref[0] += jax.lax.dot_general(xt, xt, nt, preferred_element_type=jnp.float32)


def _pre_gate_kernel(g_ref, x_ref, wg_ref, wx_ref, sh_ref, wpsi_ref,
                     z_ref, zs_ref, zq_ref, *, hw, masked):
    """Pass 2: folded-BN convs + add + ReLU + psi conv; per-batch z stats."""
    s = pl.program_id(1)

    @pl.when(s == 0)
    def _():
        zs_ref[...] = jnp.zeros_like(zs_ref)
        zq_ref[...] = jnp.zeros_like(zq_ref)

    a = jnp.dot(wg_ref[...], g_ref[0], preferred_element_type=jnp.float32)
    a = a + jnp.dot(wx_ref[...], x_ref[0], preferred_element_type=jnp.float32)
    a = jnp.maximum(a + sh_ref[...], 0.0)
    z = jnp.dot(wpsi_ref[...], a, preferred_element_type=jnp.float32)   # (1, strip)
    z_ref[0] = z
    if masked:
        strip = z.shape[1]
        col = jax.lax.broadcasted_iota(jnp.int32, (1, strip), 1)
        z = jnp.where((col + s * strip) < hw, z, 0.0)
    zs_ref[0] += jnp.sum(z, axis=1, keepdims=True)
    zq_ref[0] += jnp.sum(z * z, axis=1, keepdims=True)


def _gate_kernel(x_ref, z_ref, sc_ref, sh_ref, o_ref):
    """Pass 3: psi BN + sigmoid + gating of x."""
    t = z_ref[0] * sc_ref[...] + sh_ref[...]          # (1, strip)
    p = 1.0 / (1.0 + jnp.exp(-t))
    o_ref[0] = x_ref[0] * p                           # (F_l, strip) * (1, strip)


# ==========================================================================
# Module glue
# ==========================================================================
def attention_block_forward(g_nchw, x_nchw, params, *, force_tiled=False,
                            max_strip=None):
    n, f_g, h, w = g_nchw.shape
    f_l = x_nchw.shape[1]
    hw = h * w
    g = g_nchw.reshape(n, f_g, hw).astype(jnp.float32)
    x = x_nchw.reshape(n, f_l, hw).astype(jnp.float32)

    wg, gamma_g, beta_g = params["W_g"]
    wx, gamma_x, beta_x = params["W_x"]
    wpsi, gamma_p, beta_p = params["psi"]
    f_int = wg.shape[0]
    cnt = float(n * hw)

    # ---------------- fused VMEM-resident fast path -----------------------
    fused_bytes = 4 * hw * (n * (f_g + 2 * f_l + 1) + 3 * f_int)
    if (not force_tiled) and fused_bytes <= FUSED_VMEM_BUDGET and n <= 64:
        out = pl.pallas_call(
            _fused_kernel,
            out_shape=jax.ShapeDtypeStruct((n, f_l, hw), jnp.float32),
            scratch_shapes=[pltpu.VMEM((n, 1, hw), jnp.float32)],
            compiler_params=pltpu.CompilerParams(
                vmem_limit_bytes=VMEM_LIMIT_BYTES),
        )(g, x, wg, wx, wpsi,
          jnp.reshape(gamma_g, (f_int, 1)), jnp.reshape(beta_g, (f_int, 1)),
          jnp.reshape(gamma_x, (f_int, 1)), jnp.reshape(beta_x, (f_int, 1)),
          jnp.reshape(gamma_p, (1, 1)), jnp.reshape(beta_p, (1, 1)))
        return out.reshape(n, f_l, h, w)

    # ---------------- tiled 3-pass path ------------------------------------
    per_elem = 4 * max(3 * (f_g + f_l),                 # pass 1
                       2 * (f_g + f_l) + 2 * f_int + 3, # pass 2
                       5 * f_l + 3)                     # pass 3
    strip = _pick_strip(hw, per_elem, max_strip=max_strip)
    s_blocks = pl.cdiv(hw, strip)
    masked = (hw % strip) != 0

    # Pass 1: raw-input moments, per-batch partials (batch axis parallel).
    sg_p, gg_p, sx_p, gx_p = pl.pallas_call(
        partial(_moments_kernel, hw=hw, masked=masked),
        out_shape=(jax.ShapeDtypeStruct((n, f_g, 1), jnp.float32),
                   jax.ShapeDtypeStruct((n, f_g, f_g), jnp.float32),
                   jax.ShapeDtypeStruct((n, f_l, 1), jnp.float32),
                   jax.ShapeDtypeStruct((n, f_l, f_l), jnp.float32)),
        grid=(n, s_blocks),
        in_specs=[
            pl.BlockSpec((1, f_g, strip), lambda i, s: (i, 0, s)),
            pl.BlockSpec((1, f_l, strip), lambda i, s: (i, 0, s)),
        ],
        out_specs=(pl.BlockSpec((1, f_g, 1), lambda i, s: (i, 0, 0)),
                   pl.BlockSpec((1, f_g, f_g), lambda i, s: (i, 0, 0)),
                   pl.BlockSpec((1, f_l, 1), lambda i, s: (i, 0, 0)),
                   pl.BlockSpec((1, f_l, f_l), lambda i, s: (i, 0, 0))),
        compiler_params=pltpu.CompilerParams(
            dimension_semantics=("parallel", "arbitrary"),
            vmem_limit_bytes=VMEM_LIMIT_BYTES),
    )(g, x)

    sum_g = jnp.sum(sg_p, axis=0)          # (f_g, 1)
    gram_g = jnp.sum(gg_p, axis=0)         # (f_g, f_g)
    sum_x = jnp.sum(sx_p, axis=0)
    gram_x = jnp.sum(gx_p, axis=0)

    def branch_affine(wmat, s_in, g_in, gamma, beta):
        sum_y = wmat @ s_in                                    # (f_int, 1)
        sq_y = jnp.sum((wmat @ g_in) * wmat, axis=1, keepdims=True)
        mean = sum_y / cnt
        var = jnp.maximum(sq_y / cnt - mean * mean, 0.0)       # biased batch var
        scale = gamma[:, None] * jax.lax.rsqrt(var + EPS)
        shift = beta[:, None] - mean * scale
        return scale, shift

    scale_g, shift_g = branch_affine(wg, sum_g, gram_g, gamma_g, beta_g)
    scale_x, shift_x = branch_affine(wx, sum_x, gram_x, gamma_x, beta_x)
    wg_eff = wg * scale_g                  # fold BN scales into conv weights
    wx_eff = wx * scale_x
    shift_gx = shift_g + shift_x

    # Pass 2: folded convs + ReLU + psi conv, per-batch z stats.
    z, zs_p, zq_p = pl.pallas_call(
        partial(_pre_gate_kernel, hw=hw, masked=masked),
        out_shape=(jax.ShapeDtypeStruct((n, 1, hw), jnp.float32),
                   jax.ShapeDtypeStruct((n, 1, 1), jnp.float32),
                   jax.ShapeDtypeStruct((n, 1, 1), jnp.float32)),
        grid=(n, s_blocks),
        in_specs=[
            pl.BlockSpec((1, f_g, strip), lambda i, s: (i, 0, s)),
            pl.BlockSpec((1, f_l, strip), lambda i, s: (i, 0, s)),
            pl.BlockSpec((f_int, f_g), lambda i, s: (0, 0)),
            pl.BlockSpec((f_int, f_l), lambda i, s: (0, 0)),
            pl.BlockSpec((f_int, 1), lambda i, s: (0, 0)),
            pl.BlockSpec((1, f_int), lambda i, s: (0, 0)),
        ],
        out_specs=(pl.BlockSpec((1, 1, strip), lambda i, s: (i, 0, s)),
                   pl.BlockSpec((1, 1, 1), lambda i, s: (i, 0, 0)),
                   pl.BlockSpec((1, 1, 1), lambda i, s: (i, 0, 0))),
        compiler_params=pltpu.CompilerParams(
            dimension_semantics=("parallel", "arbitrary"),
            vmem_limit_bytes=VMEM_LIMIT_BYTES),
    )(g, x, wg_eff, wx_eff, shift_gx, wpsi)

    zs = jnp.sum(zs_p)
    zq = jnp.sum(zq_p)
    mean_p = zs / cnt
    var_p = jnp.maximum(zq / cnt - mean_p * mean_p, 0.0)
    scale_p = gamma_p[0] * jax.lax.rsqrt(var_p + EPS)
    shift_p = beta_p[0] - mean_p * scale_p
    scale_p = jnp.reshape(scale_p, (1, 1))
    shift_p = jnp.reshape(shift_p, (1, 1))

    # Pass 3: psi BN + sigmoid + gate.
    out = pl.pallas_call(
        _gate_kernel,
        out_shape=jax.ShapeDtypeStruct((n, f_l, hw), jnp.float32),
        grid=(n, s_blocks),
        in_specs=[
            pl.BlockSpec((1, f_l, strip), lambda i, s: (i, 0, s)),
            pl.BlockSpec((1, 1, strip), lambda i, s: (i, 0, s)),
            pl.BlockSpec((1, 1), lambda i, s: (0, 0)),
            pl.BlockSpec((1, 1), lambda i, s: (0, 0)),
        ],
        out_specs=pl.BlockSpec((1, f_l, strip), lambda i, s: (i, 0, s)),
        compiler_params=pltpu.CompilerParams(
            dimension_semantics=("parallel", "parallel"),
            vmem_limit_bytes=VMEM_LIMIT_BYTES),
    )(x, z, scale_p, shift_p)

    return out.reshape(n, f_l, h, w)


def init_attention_params(key, F_g, F_l, F_int):
    def conv_w(k, cout, cin):
        bound = 1.0 / (cin ** 0.5)            # PyTorch Conv2d default init range
        return jax.random.uniform(k, (cout, cin), jnp.float32, -bound, bound)

    k1, k2, k3 = jax.random.split(key, 3)
    return {
        # (weight (Cout, Cin), BN gamma, BN beta); conv biases cancel in BN.
        "W_g": (conv_w(k1, F_int, F_g),
                jnp.ones((F_int,), jnp.float32), jnp.zeros((F_int,), jnp.float32)),
        "W_x": (conv_w(k2, F_int, F_l),
                jnp.ones((F_int,), jnp.float32), jnp.zeros((F_int,), jnp.float32)),
        "psi": (conv_w(k3, 1, F_int),
                jnp.ones((1,), jnp.float32), jnp.zeros((1,), jnp.float32)),
    }


def _reference_forward(g, x, params):
    # Pure-JAX reference (training-mode BN) for a correctness check.
    def conv_bn(t, w, gamma, beta):
        y = jnp.einsum("oc,nchw->nohw", w, t)
        mean = y.mean(axis=(0, 2, 3), keepdims=True)
        var = y.var(axis=(0, 2, 3), keepdims=True)
        return ((y - mean) * jax.lax.rsqrt(var + EPS)
                * gamma[None, :, None, None] + beta[None, :, None, None])

    wg, gg, bg = params["W_g"]
    wx, gx, bx = params["W_x"]
    wp, gp, bp = params["psi"]
    a = jax.nn.relu(conv_bn(g, wg, gg, bg) + conv_bn(x, wx, gx, bx))
    p = jax.nn.sigmoid(conv_bn(a, wp, gp, bp))
    return x * p


if __name__ == "__main__":
    key = jax.random.PRNGKey(0)
    kg, kx, kp = jax.random.split(key, 3)

    N, F_g, F_l, F_int, H, W = 2, 4, 4, 8, 16, 16
    g = jax.random.normal(kg, (N, F_g, H, W), jnp.float32)
    x = jax.random.normal(kx, (N, F_l, H, W), jnp.float32)
    params = init_attention_params(kp, F_g, F_l, F_int)
    ref = _reference_forward(g, x, params)

    # 1) fused VMEM-resident fast path (taken automatically at this size)
    out_fused = jax.block_until_ready(attention_block_forward(g, x, params))
    assert out_fused.shape == (N, F_l, H, W), out_fused.shape
    assert bool(jnp.all(jnp.isfinite(out_fused)))
    err = float(jnp.max(jnp.abs(out_fused - ref)))
    assert err < 1e-3, f"fused path error {err}"

    # 2) tiled 3-pass path (forced), same inputs
    out_tiled = jax.block_until_ready(
        attention_block_forward(g, x, params, force_tiled=True))
    err = float(jnp.max(jnp.abs(out_tiled - ref)))
    assert err < 1e-3, f"tiled path error {err}"

    # 3) tiled path with a spatial extent that does not divide the strip:
    #    exercises the cdiv grid + tail-masking used for real image sizes.
    H2 = W2 = 20
    g2 = jax.random.normal(kg, (N, F_g, H2, W2), jnp.float32)
    x2 = jax.random.normal(kx, (N, F_l, H2, W2), jnp.float32)
    ref2 = _reference_forward(g2, x2, params)
    out_mask = jax.block_until_ready(
        attention_block_forward(g2, x2, params, force_tiled=True, max_strip=128))
    err = float(jnp.max(jnp.abs(out_mask - ref2)))
    assert err < 1e-3, f"masked tiled path error {err}"

    print("KERNEL_OK")
</pallas_src>

<mosaic_0001>
module attributes {stable_mosaic.version = 11 : i64} {
  func.func @_fused_kernel(%arg0: memref<2x4x256xf32, #tpu.memory_space<vmem>>, %arg1: memref<2x4x256xf32, #tpu.memory_space<vmem>>, %arg2: memref<8x4xf32, #tpu.memory_space<vmem>>, %arg3: memref<8x4xf32, #tpu.memory_space<vmem>>, %arg4: memref<1x8xf32, #tpu.memory_space<vmem>>, %arg5: memref<8x1xf32, #tpu.memory_space<vmem>>, %arg6: memref<8x1xf32, #tpu.memory_space<vmem>>, %arg7: memref<8x1xf32, #tpu.memory_space<vmem>>, %arg8: memref<8x1xf32, #tpu.memory_space<vmem>>, %arg9: memref<1x1xf32, #tpu.memory_space<vmem>>, %arg10: memref<1x1xf32, #tpu.memory_space<vmem>>, %arg11: memref<2x4x256xf32, #tpu.memory_space<vmem>>, %arg12: memref<2x1x256xf32, #tpu.memory_space<vmem>>) attributes {dimension_semantics = [], scalar_prefetch = 0 : i64, scratch_operands = 1 : i64, tpu.core_type = #tpu.core_type<tc>} {
    %c0 = arith.constant 0 : index
    %c0_0 = arith.constant 0 : index
    %0 = vector.load %arg2[%c0, %c0_0] : memref<8x4xf32, #tpu.memory_space<vmem>>, vector<8x4xf32>
    %c0_1 = arith.constant 0 : index
    %c0_2 = arith.constant 0 : index
    %1 = vector.load %arg3[%c0_1, %c0_2] : memref<8x4xf32, #tpu.memory_space<vmem>>, vector<8x4xf32>
    %c0_3 = arith.constant 0 : index
    %c0_4 = arith.constant 0 : index
    %2 = vector.load %arg4[%c0_3, %c0_4] : memref<1x8xf32, #tpu.memory_space<vmem>>, vector<1x8xf32>
    %cst = arith.constant 0.000000e+00 : f32
    %3 = vector.broadcast %cst : f32 to vector<8x1xf32>
    %cst_5 = arith.constant 0.000000e+00 : f32
    %4 = vector.broadcast %cst_5 : f32 to vector<8x1xf32>
    %cst_6 = arith.constant 0.000000e+00 : f32
    %5 = vector.broadcast %cst_6 : f32 to vector<8x1xf32>
    %cst_7 = arith.constant 0.000000e+00 : f32
    %6 = vector.broadcast %cst_7 : f32 to vector<8x1xf32>
    %c0_8 = arith.constant 0 : index
    %c0_9 = arith.constant 0 : index
    %c0_10 = arith.constant 0 : index
    %7 = vector.load %arg0[%c0_8, %c0_9, %c0_10] : memref<2x4x256xf32, #tpu.memory_space<vmem>>, vector<1x4x256xf32>
    %8 = vector.shape_cast %7 : vector<1x4x256xf32> to vector<4x256xf32>
    %cst_11 = arith.constant dense<0.000000e+00> : vector<8x256xf32>
    %9 = tpu.matmul %0, %8, %cst_11 {dimension_numbers = #tpu.dot_dimension_numbers<[1], [0], [0], [1], [0, 0, 1, 1], [], []>} : vector<8x4xf32>, vector<4x256xf32>, vector<8x256xf32> -> vector<8x256xf32>
    %c0_12 = arith.constant 0 : index
    %c0_13 = arith.constant 0 : index
    %c0_14 = arith.constant 0 : index
    %10 = vector.load %arg1[%c0_12, %c0_13, %c0_14] : memref<2x4x256xf32, #tpu.memory_space<vmem>>, vector<1x4x256xf32>
    %11 = vector.shape_cast %10 : vector<1x4x256xf32> to vector<4x256xf32>
    %cst_15 = arith.constant dense<0.000000e+00> : vector<8x256xf32>
    %12 = tpu.matmul %1, %11, %cst_15 {dimension_numbers = #tpu.dot_dimension_numbers<[1], [0], [0], [1], [0, 0, 1, 1], [], []>} : vector<8x4xf32>, vector<4x256xf32>, vector<8x256xf32> -> vector<8x256xf32>
    %cst_16 = arith.constant dense<0.000000e+00> : vector<8xf32>
    %13 = vector.multi_reduction <add>, %9, %cst_16 [1] : vector<8x256xf32> to vector<8xf32>
    %14 = vector.shape_cast %13 : vector<8xf32> to vector<8x1xf32>
    %15 = arith.addf %3, %14 : vector<8x1xf32>
    %16 = arith.mulf %9, %9 : vector<8x256xf32>
    %cst_17 = arith.constant dense<0.000000e+00> : vector<8xf32>
    %17 = vector.multi_reduction <add>, %16, %cst_17 [1] : vector<8x256xf32> to vector<8xf32>
    %18 = vector.shape_cast %17 : vector<8xf32> to vector<8x1xf32>
    %19 = arith.addf %4, %18 : vector<8x1xf32>
    %cst_18 = arith.constant dense<0.000000e+00> : vector<8xf32>
    %20 = vector.multi_reduction <add>, %12, %cst_18 [1] : vector<8x256xf32> to vector<8xf32>
    %21 = vector.shape_cast %20 : vector<8xf32> to vector<8x1xf32>
    %22 = arith.addf %5, %21 : vector<8x1xf32>
    %23 = arith.mulf %12, %12 : vector<8x256xf32>
    %cst_19 = arith.constant dense<0.000000e+00> : vector<8xf32>
    %24 = vector.multi_reduction <add>, %23, %cst_19 [1] : vector<8x256xf32> to vector<8xf32>
    %25 = vector.shape_cast %24 : vector<8xf32> to vector<8x1xf32>
    %26 = arith.addf %6, %25 : vector<8x1xf32>
    %c1 = arith.constant 1 : index
    %c0_20 = arith.constant 0 : index
    %c0_21 = arith.constant 0 : index
    %27 = vector.load %arg0[%c1, %c0_20, %c0_21] : memref<2x4x256xf32, #tpu.memory_space<vmem>>, vector<1x4x256xf32>
    %28 = vector.shape_cast %27 : vector<1x4x256xf32> to vector<4x256xf32>
    %cst_22 = arith.constant dense<0.000000e+00> : vector<8x256xf32>
    %29 = tpu.matmul %0, %28, %cst_22 {dimension_numbers = #tpu.dot_dimension_numbers<[1], [0], [0], [1], [0, 0, 1, 1], [], []>} : vector<8x4xf32>, vector<4x256xf32>, vector<8x256xf32> -> vector<8x256xf32>
    %c1_23 = arith.constant 1 : index
    %c0_24 = arith.constant 0 : index
    %c0_25 = arith.constant 0 : index
    %30 = vector.load %arg1[%c1_23, %c0_24, %c0_25] : memref<2x4x256xf32, #tpu.memory_space<vmem>>, vector<1x4x256xf32>
    %31 = vector.shape_cast %30 : vector<1x4x256xf32> to vector<4x256xf32>
    %cst_26 = arith.constant dense<0.000000e+00> : vector<8x256xf32>
    %32 = tpu.matmul %1, %31, %cst_26 {dimension_numbers = #tpu.dot_dimension_numbers<[1], [0], [0], [1], [0, 0, 1, 1], [], []>} : vector<8x4xf32>, vector<4x256xf32>, vector<8x256xf32> -> vector<8x256xf32>
    %cst_27 = arith.constant dense<0.000000e+00> : vector<8xf32>
    %33 = vector.multi_reduction <add>, %29, %cst_27 [1] : vector<8x256xf32> to vector<8xf32>
    %34 = vector.shape_cast %33 : vector<8xf32> to vector<8x1xf32>
    %35 = arith.addf %15, %34 : vector<8x1xf32>
    %36 = arith.mulf %29, %29 : vector<8x256xf32>
    %cst_28 = arith.constant dense<0.000000e+00> : vector<8xf32>
    %37 = vector.multi_reduction <add>, %36, %cst_28 [1] : vector<8x256xf32> to vector<8xf32>
    %38 = vector.shape_cast %37 : vector<8xf32> to vector<8x1xf32>
    %39 = arith.addf %19, %38 : vector<8x1xf32>
    %cst_29 = arith.constant dense<0.000000e+00> : vector<8xf32>
    %40 = vector.multi_reduction <add>, %32, %cst_29 [1] : vector<8x256xf32> to vector<8xf32>
    %41 = vector.shape_cast %40 : vector<8xf32> to vector<8x1xf32>
    %42 = arith.addf %22, %41 : vector<8x1xf32>
    %43 = arith.mulf %32, %32 : vector<8x256xf32>
    %cst_30 = arith.constant dense<0.000000e+00> : vector<8xf32>
    %44 = vector.multi_reduction <add>, %43, %cst_30 [1] : vector<8x256xf32> to vector<8xf32>
    %45 = vector.shape_cast %44 : vector<8xf32> to vector<8x1xf32>
    %46 = arith.addf %26, %45 : vector<8x1xf32>
    %c0_31 = arith.constant 0 : index
    %c0_32 = arith.constant 0 : index
    %47 = vector.load %arg5[%c0_31, %c0_32] : memref<8x1xf32, #tpu.memory_space<vmem>>, vector<8x1xf32>
    %c0_33 = arith.constant 0 : index
    %c0_34 = arith.constant 0 : index
    %48 = vector.load %arg6[%c0_33, %c0_34] : memref<8x1xf32, #tpu.memory_space<vmem>>, vector<8x1xf32>
    %cst_35 = arith.constant 5.120000e+02 : f32
    %49 = vector.broadcast %cst_35 : f32 to vector<8x1xf32>
    %50 = arith.divf %35, %49 : vector<8x1xf32>
    %cst_36 = arith.constant 5.120000e+02 : f32
    %51 = vector.broadcast %cst_36 : f32 to vector<8x1xf32>
    %52 = arith.divf %39, %51 : vector<8x1xf32>
    %53 = arith.mulf %50, %50 : vector<8x1xf32>
    %54 = arith.subf %52, %53 : vector<8x1xf32>
    %cst_37 = arith.constant 0.000000e+00 : f32
    %55 = vector.broadcast %cst_37 : f32 to vector<8x1xf32>
    %56 = arith.maximumf %54, %55 : vector<8x1xf32>
    %cst_38 = arith.constant 9.99999974E-6 : f32
    %57 = vector.broadcast %cst_38 : f32 to vector<8x1xf32>
    %58 = arith.addf %56, %57 : vector<8x1xf32>
    %59 = math.rsqrt %58 : vector<8x1xf32>
    %60 = arith.mulf %47, %59 : vector<8x1xf32>
    %61 = arith.mulf %50, %60 : vector<8x1xf32>
    %62 = arith.subf %48, %61 : vector<8x1xf32>
    %c0_39 = arith.constant 0 : index
    %c0_40 = arith.constant 0 : index
    %63 = vector.load %arg7[%c0_39, %c0_40] : memref<8x1xf32, #tpu.memory_space<vmem>>, vector<8x1xf32>
    %c0_41 = arith.constant 0 : index
    %c0_42 = arith.constant 0 : index
    %64 = vector.load %arg8[%c0_41, %c0_42] : memref<8x1xf32, #tpu.memory_space<vmem>>, vector<8x1xf32>
    %cst_43 = arith.constant 5.120000e+02 : f32
    %65 = vector.broadcast %cst_43 : f32 to vector<8x1xf32>
    %66 = arith.divf %42, %65 : vector<8x1xf32>
    %cst_44 = arith.constant 5.120000e+02 : f32
    %67 = vector.broadcast %cst_44 : f32 to vector<8x1xf32>
    %68 = arith.divf %46, %67 : vector<8x1xf32>
    %69 = arith.mulf %66, %66 : vector<8x1xf32>
    %70 = arith.subf %68, %69 : vector<8x1xf32>
    %cst_45 = arith.constant 0.000000e+00 : f32
    %71 = vector.broadcast %cst_45 : f32 to vector<8x1xf32>
    %72 = arith.maximumf %70, %71 : vector<8x1xf32>
    %cst_46 = arith.constant 9.99999974E-6 : f32
    %73 = vector.broadcast %cst_46 : f32 to vector<8x1xf32>
    %74 = arith.addf %72, %73 : vector<8x1xf32>
    %75 = math.rsqrt %74 : vector<8x1xf32>
    %76 = arith.mulf %63, %75 : vector<8x1xf32>
    %77 = arith.mulf %66, %76 : vector<8x1xf32>
    %78 = arith.subf %64, %77 : vector<8x1xf32>
    %79 = vector.broadcast %60 : vector<8x1xf32> to vector<8x4xf32>
    %80 = arith.mulf %0, %79 : vector<8x4xf32>
    %81 = vector.broadcast %76 : vector<8x1xf32> to vector<8x4xf32>
    %82 = arith.mulf %1, %81 : vector<8x4xf32>
    %83 = arith.addf %62, %78 : vector<8x1xf32>
    %cst_47 = arith.constant 0.000000e+00 : f32
    %84 = vector.broadcast %cst_47 : f32 to vector<1x1xf32>
    %cst_48 = arith.constant 0.000000e+00 : f32
    %85 = vector.broadcast %cst_48 : f32 to vector<1x1xf32>
    %c0_49 = arith.constant 0 : index
    %c0_50 = arith.constant 0 : index
    %c0_51 = arith.constant 0 : index
    %86 = vector.load %arg0[%c0_49, %c0_50, %c0_51] : memref<2x4x256xf32, #tpu.memory_space<vmem>>, vector<1x4x256xf32>
    %87 = vector.shape_cast %86 : vector<1x4x256xf32> to vector<4x256xf32>
    %cst_52 = arith.constant dense<0.000000e+00> : vector<8x256xf32>
    %88 = tpu.matmul %80, %87, %cst_52 {dimension_numbers = #tpu.dot_dimension_numbers<[1], [0], [0], [1], [0, 0, 1, 1], [], []>} : vector<8x4xf32>, vector<4x256xf32>, vector<8x256xf32> -> vector<8x256xf32>
    %c0_53 = arith.constant 0 : index
    %c0_54 = arith.constant 0 : index
    %c0_55 = arith.constant 0 : index
    %89 = vector.load %arg1[%c0_53, %c0_54, %c0_55] : memref<2x4x256xf32, #tpu.memory_space<vmem>>, vector<1x4x256xf32>
    %90 = vector.shape_cast %89 : vector<1x4x256xf32> to vector<4x256xf32>
    %cst_56 = arith.constant dense<0.000000e+00> : vector<8x256xf32>
    %91 = tpu.matmul %82, %90, %cst_56 {dimension_numbers = #tpu.dot_dimension_numbers<[1], [0], [0], [1], [0, 0, 1, 1], [], []>} : vector<8x4xf32>, vector<4x256xf32>, vector<8x256xf32> -> vector<8x256xf32>
    %92 = arith.addf %88, %91 : vector<8x256xf32>
    %93 = vector.broadcast %83 : vector<8x1xf32> to vector<8x256xf32>
    %94 = arith.addf %92, %93 : vector<8x256xf32>
    %cst_57 = arith.constant 0.000000e+00 : f32
    %95 = vector.broadcast %cst_57 : f32 to vector<8x256xf32>
    %96 = arith.maximumf %94, %95 : vector<8x256xf32>
    %cst_58 = arith.constant dense<0.000000e+00> : vector<1x256xf32>
    %97 = tpu.matmul %2, %96, %cst_58 {dimension_numbers = #tpu.dot_dimension_numbers<[1], [0], [0], [1], [0, 0, 1, 1], [], []>} : vector<1x8xf32>, vector<8x256xf32>, vector<1x256xf32> -> vector<1x256xf32>
    %c0_59 = arith.constant 0 : index
    %c0_60 = arith.constant 0 : index
    %c0_61 = arith.constant 0 : index
    %98 = vector.load %arg12[%c0_59, %c0_60, %c0_61] : memref<2x1x256xf32, #tpu.memory_space<vmem>>, vector<1x1x256xf32>
    %99 = vector.shape_cast %98 : vector<1x1x256xf32> to vector<1x256xf32>
    %100 = vector.shape_cast %97 : vector<1x256xf32> to vector<1x1x256xf32>
    tpu.vector_store %arg12[%c0_59, %c0_60, %c0_61], %100 {strides = array<i32>} : memref<2x1x256xf32, #tpu.memory_space<vmem>>, vector<1x1x256xf32>,
    %cst_62 = arith.constant dense<0.000000e+00> : vector<1xf32>
    %101 = vector.multi_reduction <add>, %97, %cst_62 [1] : vector<1x256xf32> to vector<1xf32>
    %102 = vector.shape_cast %101 : vector<1xf32> to vector<1x1xf32>
    %103 = arith.addf %84, %102 : vector<1x1xf32>
    %104 = arith.mulf %97, %97 : vector<1x256xf32>
    %cst_63 = arith.constant dense<0.000000e+00> : vector<1xf32>
    %105 = vector.multi_reduction <add>, %104, %cst_63 [1] : vector<1x256xf32> to vector<1xf32>
    %106 = vector.shape_cast %105 : vector<1xf32> to vector<1x1xf32>
    %107 = arith.addf %85, %106 : vector<1x1xf32>
    %c1_64 = arith.constant 1 : index
    %c0_65 = arith.constant 0 : index
    %c0_66 = arith.constant 0 : index
    %108 = vector.load %arg0[%c1_64, %c0_65, %c0_66] : memref<2x4x256xf32, #tpu.memory_space<vmem>>, vector<1x4x256xf32>
    %109 = vector.shape_cast %108 : vector<1x4x256xf32> to vector<4x256xf32>
    %cst_67 = arith.constant dense<0.000000e+00> : vector<8x256xf32>
    %110 = tpu.matmul %80, %109, %cst_67 {dimension_numbers = #tpu.dot_dimension_numbers<[1], [0], [0], [1], [0, 0, 1, 1], [], []>} : vector<8x4xf32>, vector<4x256xf32>, vector<8x256xf32> -> vector<8x256xf32>
    %c1_68 = arith.constant 1 : index
    %c0_69 = arith.constant 0 : index
    %c0_70 = arith.constant 0 : index
    %111 = vector.load %arg1[%c1_68, %c0_69, %c0_70] : memref<2x4x256xf32, #tpu.memory_space<vmem>>, vector<1x4x256xf32>
    %112 = vector.shape_cast %111 : vector<1x4x256xf32> to vector<4x256xf32>
    %cst_71 = arith.constant dense<0.000000e+00> : vector<8x256xf32>
    %113 = tpu.matmul %82, %112, %cst_71 {dimension_numbers = #tpu.dot_dimension_numbers<[1], [0], [0], [1], [0, 0, 1, 1], [], []>} : vector<8x4xf32>, vector<4x256xf32>, vector<8x256xf32> -> vector<8x256xf32>
    %114 = arith.addf %110, %113 : vector<8x256xf32>
    %115 = vector.broadcast %83 : vector<8x1xf32> to vector<8x256xf32>
    %116 = arith.addf %114, %115 : vector<8x256xf32>
    %cst_72 = arith.constant 0.000000e+00 : f32
    %117 = vector.broadcast %cst_72 : f32 to vector<8x256xf32>
    %118 = arith.maximumf %116, %117 : vector<8x256xf32>
    %cst_73 = arith.constant dense<0.000000e+00> : vector<1x256xf32>
    %119 = tpu.matmul %2, %118, %cst_73 {dimension_numbers = #tpu.dot_dimension_numbers<[1], [0], [0], [1], [0, 0, 1, 1], [], []>} : vector<1x8xf32>, vector<8x256xf32>, vector<1x256xf32> -> vector<1x256xf32>
    %c1_74 = arith.constant 1 : index
    %c0_75 = arith.constant 0 : index
    %c0_76 = arith.constant 0 : index
    %120 = vector.load %arg12[%c1_74, %c0_75, %c0_76] : memref<2x1x256xf32, #tpu.memory_space<vmem>>, vector<1x1x256xf32>
    %121 = vector.shape_cast %120 : vector<1x1x256xf32> to vector<1x256xf32>
    %122 = vector.shape_cast %119 : vector<1x256xf32> to vector<1x1x256xf32>
    tpu.vector_store %arg12[%c1_74, %c0_75, %c0_76], %122 {strides = array<i32>} : memref<2x1x256xf32, #tpu.memory_space<vmem>>, vector<1x1x256xf32>,
    %cst_77 = arith.constant dense<0.000000e+00> : vector<1xf32>
    %123 = vector.multi_reduction <add>, %119, %cst_77 [1] : vector<1x256xf32> to vector<1xf32>
    %124 = vector.shape_cast %123 : vector<1xf32> to vector<1x1xf32>
    %125 = arith.addf %103, %124 : vector<1x1xf32>
    %126 = arith.mulf %119, %119 : vector<1x256xf32>
    %cst_78 = arith.constant dense<0.000000e+00> : vector<1xf32>
    %127 = vector.multi_reduction <add>, %126, %cst_78 [1] : vector<1x256xf32> to vector<1xf32>
    %128 = vector.shape_cast %127 : vector<1xf32> to vector<1x1xf32>
    %129 = arith.addf %107, %128 : vector<1x1xf32>
    %c0_79 = arith.constant 0 : index
    %c0_80 = arith.constant 0 : index
    %130 = vector.load %arg9[%c0_79, %c0_80] : memref<1x1xf32, #tpu.memory_space<vmem>>, vector<1x1xf32>
    %c0_81 = arith.constant 0 : index
    %c0_82 = arith.constant 0 : index
    %131 = vector.load %arg10[%c0_81, %c0_82] : memref<1x1xf32, #tpu.memory_space<vmem>>, vector<1x1xf32>
    %cst_83 = arith.constant 5.120000e+02 : f32
    %132 = vector.broadcast %cst_83 : f32 to vector<1x1xf32>
    %133 = arith.divf %125, %132 : vector<1x1xf32>
    %cst_84 = arith.constant 5.120000e+02 : f32
    %134 = vector.broadcast %cst_84 : f32 to vector<1x1xf32>
    %135 = arith.divf %129, %134 : vector<1x1xf32>
    %136 = arith.mulf %133, %133 : vector<1x1xf32>
    %137 = arith.subf %135, %136 : vector<1x1xf32>
    %cst_85 = arith.constant 0.000000e+00 : f32
    %138 = vector.broadcast %cst_85 : f32 to vector<1x1xf32>
    %139 = arith.maximumf %137, %138 : vector<1x1xf32>
    %cst_86 = arith.constant 9.99999974E-6 : f32
    %140 = vector.broadcast %cst_86 : f32 to vector<1x1xf32>
    %141 = arith.addf %139, %140 : vector<1x1xf32>
    %142 = math.rsqrt %141 : vector<1x1xf32>
    %143 = arith.mulf %130, %142 : vector<1x1xf32>
    %144 = arith.mulf %133, %143 : vector<1x1xf32>
    %145 = arith.subf %131, %144 : vector<1x1xf32>
    %c0_87 = arith.constant 0 : index
    %c0_88 = arith.constant 0 : index
    %c0_89 = arith.constant 0 : index
    %146 = vector.load %arg12[%c0_87, %c0_88, %c0_89] : memref<2x1x256xf32, #tpu.memory_space<vmem>>, vector<1x1x256xf32>
    %147 = vector.shape_cast %146 : vector<1x1x256xf32> to vector<1x256xf32>
    %148 = vector.broadcast %143 : vector<1x1xf32> to vector<1x256xf32>
    %149 = arith.mulf %147, %148 : vector<1x256xf32>
    %150 = vector.broadcast %145 : vector<1x1xf32> to vector<1x256xf32>
    %151 = arith.addf %149, %150 : vector<1x256xf32>
    %cst_90 = arith.constant 0.000000e+00 : f32
    %152 = vector.broadcast %cst_90 : f32 to vector<1x256xf32>
    %153 = arith.subf %152, %151 : vector<1x256xf32>
    %154 = math.exp %153 : vector<1x256xf32>
    %cst_91 = arith.constant 1.000000e+00 : f32
    %155 = vector.broadcast %cst_91 : f32 to vector<1x256xf32>
    %156 = arith.addf %155, %154 : vector<1x256xf32>
    %cst_92 = arith.constant 1.000000e+00 : f32
    %157 = vector.broadcast %cst_92 : f32 to vector<1x256xf32>
    %158 = arith.divf %157, %156 : vector<1x256xf32>
    %c0_93 = arith.constant 0 : index
    %c0_94 = arith.constant 0 : index
    %c0_95 = arith.constant 0 : index
    %159 = vector.load %arg1[%c0_93, %c0_94, %c0_95] : memref<2x4x256xf32, #tpu.memory_space<vmem>>, vector<1x4x256xf32>
    %160 = vector.shape_cast %159 : vector<1x4x256xf32> to vector<4x256xf32>
    %161 = vector.broadcast %158 : vector<1x256xf32> to vector<4x256xf32>
    %162 = arith.mulf %160, %161 : vector<4x256xf32>
    %c0_96 = arith.constant 0 : index
    %c0_97 = arith.constant 0 : index
    %c0_98 = arith.constant 0 : index
    %163 = vector.load %arg11[%c0_96, %c0_97, %c0_98] : memref<2x4x256xf32, #tpu.memory_space<vmem>>, vector<1x4x256xf32>
    %164 = vector.shape_cast %163 : vector<1x4x256xf32> to vector<4x256xf32>
    %165 = vector.shape_cast %162 : vector<4x256xf32> to vector<1x4x256xf32>
    tpu.vector_store %arg11[%c0_96, %c0_97, %c0_98], %165 {strides = array<i32>} : memref<2x4x256xf32, #tpu.memory_space<vmem>>, vector<1x4x256xf32>,
    %c1_99 = arith.constant 1 : index
    %c0_100 = arith.constant 0 : index
    %c0_101 = arith.constant 0 : index
    %166 = vector.load %arg12[%c1_99, %c0_100, %c0_101] : memref<2x1x256xf32, #tpu.memory_space<vmem>>, vector<1x1x256xf32>
    %167 = vector.shape_cast %166 : vector<1x1x256xf32> to vector<1x256xf32>
    %168 = vector.broadcast %143 : vector<1x1xf32> to vector<1x256xf32>
    %169 = arith.mulf %167, %168 : vector<1x256xf32>
    %170 = vector.broadcast %145 : vector<1x1xf32> to vector<1x256xf32>
    %171 = arith.addf %169, %170 : vector<1x256xf32>
    %cst_102 = arith.constant 0.000000e+00 : f32
    %172 = vector.broadcast %cst_102 : f32 to vector<1x256xf32>
    %173 = arith.subf %172, %171 : vector<1x256xf32>
    %174 = math.exp %173 : vector<1x256xf32>
    %cst_103 = arith.constant 1.000000e+00 : f32
    %175 = vector.broadcast %cst_103 : f32 to vector<1x256xf32>
    %176 = arith.addf %175, %174 : vector<1x256xf32>
    %cst_104 = arith.constant 1.000000e+00 : f32
    %177 = vector.broadcast %cst_104 : f32 to vector<1x256xf32>
    %178 = arith.divf %177, %176 : vector<1x256xf32>
    %c1_105 = arith.constant 1 : index
    %c0_106 = arith.constant 0 : index
    %c0_107 = arith.constant 0 : index
    %179 = vector.load %arg1[%c1_105, %c0_106, %c0_107] : memref<2x4x256xf32, #tpu.memory_space<vmem>>, vector<1x4x256xf32>
    %180 = vector.shape_cast %179 : vector<1x4x256xf32> to vector<4x256xf32>
    %181 = vector.broadcast %178 : vector<1x256xf32> to vector<4x256xf32>
    %182 = arith.mulf %180, %181 : vector<4x256xf32>
    %c1_108 = arith.constant 1 : index
    %c0_109 = arith.constant 0 : index
    %c0_110 = arith.constant 0 : index
    %183 = vector.load %arg11[%c1_108, %c0_109, %c0_110] : memref<2x4x256xf32, #tpu.memory_space<vmem>>, vector<1x4x256xf32>
    %184 = vector.shape_cast %183 : vector<1x4x256xf32> to vector<4x256xf32>
    %185 = vector.shape_cast %182 : vector<4x256xf32> to vector<1x4x256xf32>
    tpu.vector_store %arg11[%c1_108, %c0_109, %c0_110], %185 {strides = array<i32>} : memref<2x4x256xf32, #tpu.memory_space<vmem>>, vector<1x4x256xf32>,
    return
  }
}

</mosaic_0001>

<bundles_post_ra>
// kernel: tpu_custom_call.1
= control target key start
LH: loop header
LB: loop body
LE: loop exit
PB: predicated region body
PF: predicated region fallthrough
CT: control target
= control target key end

     0   :  { %s1795_s0 = inlined_call_operand.hbm [shape: f32[2,4,256], index: 0, kind: input, shape index: {}]   ;;  %s1796_s1 = inlined_call_operand.hbm [shape: f32[2,4,256], index: 1, kind: input, shape index: {}]   ;;  %s1797_s2 = inlined_call_operand.hbm [shape: f32[8,4], index: 2, kind: input, shape index: {}]   ;;  %s1798_s3 = inlined_call_operand.hbm [shape: f32[8,4], index: 3, kind: input, shape index: {}]   ;;  %s1799_s4 = inlined_call_operand.hbm [shape: f32[1,8], index: 4, kind: input, shape index: {}]   ;;  %s1800_s5 = inlined_call_operand.hbm [shape: f32[8,1], index: 5, kind: input, shape index: {}]   ;;  %s1801_s6 = inlined_call_operand.hbm [shape: f32[8,1], index: 6, kind: input, shape index: {}]   ;;  %s1802_s7 = inlined_call_operand.hbm [shape: f32[8,1], index: 7, kind: input, shape index: {}]   ;;  %s1803_s8 = inlined_call_operand.hbm [shape: f32[8,1], index: 8, kind: input, shape index: {}]   ;;  %s1804_s9 = inlined_call_operand.<no memory space> [shape: f32[1,1], index: 9, kind: input, shape index: {}]   ;;  %s1805_s11 = inlined_call_operand.hbm [shape: f32[2,4,256], index: 11, kind: output, shape index: {}]   ;;  %s1806_s10 = inlined_call_operand.<no memory space> [shape: f32[1,1], index: 10, kind: input, shape index: {}]  }
   0x1   :  { %v16_v0 = vstv %s1804_s9  ;;  %v18_v1 = vstv %s1806_s10 }
   0x2   :  { %17 = vst [vmem:[#allocation3] sm:$0x1] %v16_v0  ;;  %19 = vst [vmem:[#allocation4] sm:$0x1] %v18_v1 }
   0x3   :  { %20 = vsyncpa [#allocation6], 0 }
   0x4   :  { %21 = vsyncpa [#allocation9], 0 }
   0x5   :  { %22 = vsyncpa [#allocation12], 0 }
   0x6   :  { %23 = vsyncpa [#allocation15], 0 }
   0x7   :  { %24 = vsyncpa [#allocation18], 0 }
   0x8   :  { %25 = vsyncpa [#allocation7], 0  ;;  %s1484_s21 = smov [#allocation8]   ;;  %s1485_s23 = smov [#allocation11]  }
   0x9   :  { %s43_s22 = sshll.u32 %s1484_s21, 4  ;;  %s66_s24 = sshll.u32 %s1485_s23, 4  ;;  %s44_s22 = int_to_ptr.vmem [resolvable:$true] %s43_s22  ;;  %s67_s24 = int_to_ptr.vmem [resolvable:$true] %s66_s24 }
   0xa   :  { %s1252_s26 = scalar_lea.hbm %s1796_s1, 256 }
   0xb   :  { %p1253_p0 = scmp.ne.s32.totalorder %s1796_s1, %s1252_s26  ;;  %p1256_p1 = scmp.lt.u32.totalorder %s1252_s26, %s1796_s1 }
   0xd   :  { %p1258_p2 = pnand %p1256_p1, %p1253_p0 }
   0xf   :  { %1261 = shalt.err (!%p1258_p2)
}
  0x10   :  { %s1262_s30 = scalar_lea.vmem %s44_s22, 256  ;;  %p1267_p4 = scmp.lt.s32.totalorder %s44_s22, %s44_s22 }
  0x11   :  { %p1263_p3 = scmp.ne.s32.totalorder %s44_s22, %s1262_s30  ;;  %p1268_p5 = scmp.lt.s32.totalorder %s1262_s30, %s1262_s30 }
  0x13   :  { %p1269_p6 = por %p1268_p5, %p1267_p4 }
  0x15   :  { %p1270_p7 = pnand %p1269_p6, %p1263_p3 }
  0x17   :  { %1273 = shalt.err (!%p1270_p7)
}
  0x18   :  { %s1486_s12 = smov 128   ;;  %s1487_s13 = smov 8  }
  0x19   :  { %49 = dma.hbm_to_vmem [thread:$0]  %s1796_s1, 256, %s44_s22, [#allocation9], %s1486_s12, %s1486_s12, %s1487_s13  }
  0x1a   :  { %s1274_s18 = scalar_lea.hbm %s1798_s3, 128 }
  0x1b   :  { %p1275_p8 = scmp.ne.s32.totalorder %s1798_s3, %s1274_s18  ;;  %p1278_p9 = scmp.lt.u32.totalorder %s1274_s18, %s1798_s3 }
  0x1d   :  { %p1280_p10 = pnand %p1278_p9, %p1275_p8 }
  0x1f   :  { %1283 = shalt.err (!%p1280_p10)
}
  0x20   :  { %s1284_s25 = scalar_lea.vmem %s67_s24, 128  ;;  %p1289_p12 = scmp.lt.s32.totalorder %s67_s24, %s67_s24 }
  0x21   :  { %p1285_p11 = scmp.ne.s32.totalorder %s67_s24, %s1284_s25  ;;  %p1290_p13 = scmp.lt.s32.totalorder %s1284_s25, %s1284_s25 }
  0x23   :  { %p1291_p0 = por %p1290_p13, %p1289_p12 }
  0x25   :  { %p1292_p1 = pnand %p1291_p0, %p1285_p11 }
  0x27   :  { %1295 = shalt.err (!%p1292_p1)
}
  0x28   :  { %69 = dma.hbm_to_vmem [thread:$0]  %s1798_s3, 128, %s67_s24, [#allocation12]  }
  0x29   :  { %s1488_s9 = smov [#allocation14]   ;;  %s1489_s27 = smov [#allocation17]  }
  0x2a   :  { %s86_s26 = sshll.u32 %s1488_s9, 4  ;;  %s106_s10 = sshll.u32 %s1489_s27, 4  ;;  %s87_s26 = int_to_ptr.vmem [resolvable:$true] %s86_s26  ;;  %s107_s10 = int_to_ptr.vmem [resolvable:$true] %s106_s10 }
  0x2b   :  { %s1296_s30 = scalar_lea.hbm %s1800_s5, 128 }
  0x2c   :  { %p1297_p2 = scmp.ne.s32.totalorder %s1800_s5, %s1296_s30  ;;  %p1300_p3 = scmp.lt.u32.totalorder %s1296_s30, %s1800_s5 }
  0x2e   :  { %p1302_p4 = pnand %p1300_p3, %p1297_p2 }
  0x30   :  { %1305 = shalt.err (!%p1302_p4)
}
  0x31   :  { %s1306_s3 = scalar_lea.vmem %s87_s26, 128  ;;  %p1311_p6 = scmp.lt.s32.totalorder %s87_s26, %s87_s26 }
  0x32   :  { %p1307_p5 = scmp.ne.s32.totalorder %s87_s26, %s1306_s3  ;;  %p1312_p7 = scmp.lt.s32.totalorder %s1306_s3, %s1306_s3 }
  0x34   :  { %p1313_p8 = por %p1312_p7, %p1311_p6 }
  0x36   :  { %p1314_p9 = pnand %p1313_p8, %p1307_p5 }
  0x38   :  { %1317 = shalt.err (!%p1314_p9)
}
  0x39   :  { %89 = dma.hbm_to_vmem [thread:$0]  %s1800_s5, 128, %s87_s26, [#allocation15]  }
  0x3a   :  { %s1318_s21 = scalar_lea.hbm %s1802_s7, 128 }
  0x3b   :  { %p1319_p10 = scmp.ne.s32.totalorder %s1802_s7, %s1318_s21  ;;  %p1322_p11 = scmp.lt.u32.totalorder %s1318_s21, %s1802_s7 }
  0x3d   :  { %p1324_p12 = pnand %p1322_p11, %p1319_p10 }
  0x3f   :  { %1327 = shalt.err (!%p1324_p12)
}
  0x40   :  { %s1328_s9 = scalar_lea.vmem %s107_s10, 128  ;;  %p1333_p0 = scmp.lt.s32.totalorder %s107_s10, %s107_s10 }
  0x41   :  { %p1329_p13 = scmp.ne.s32.totalorder %s107_s10, %s1328_s9  ;;  %p1334_p1 = scmp.lt.s32.totalorder %s1328_s9, %s1328_s9 }
  0x43   :  { %p1335_p2 = por %p1334_p1, %p1333_p0 }
  0x45   :  { %p1336_p3 = pnand %p1335_p2, %p1329_p13 }
  0x47   :  { %1339 = shalt.err (!%p1336_p3)
}
  0x48   :  { %109 = dma.hbm_to_vmem [thread:$0]  %s1802_s7, 128, %s107_s10, [#allocation18]  }
  0x49   :  { %s1490_s27 = smov [#allocation5]   ;;  %s1491_s29 = smov [#allocation10]  }
  0x4a   :  { %s31_s28 = sshll.u32 %s1490_s27, 4  ;;  %s56_s30 = sshll.u32 %s1491_s29, 4  ;;  %s32_s28 = int_to_ptr.vmem [resolvable:$true] %s31_s28  ;;  %s57_s30 = int_to_ptr.vmem [resolvable:$true] %s56_s30 }
  0x4b   :  { %s1340_s16 = scalar_lea.hbm %s1795_s0, 256 }
  0x4c   :  { %p1341_p4 = scmp.ne.s32.totalorder %s1795_s0, %s1340_s16  ;;  %p1344_p5 = scmp.lt.u32.totalorder %s1340_s16, %s1795_s0 }
  0x4e   :  { %p1346_p6 = pnand %p1344_p5, %p1341_p4 }
  0x50   :  { %1349 = shalt.err (!%p1346_p6)
}
  0x51   :  { %s1350_s7 = scalar_lea.vmem %s32_s28, 256  ;;  %p1355_p8 = scmp.lt.s32.totalorder %s32_s28, %s32_s28 }
  0x52   :  { %p1351_p7 = scmp.ne.s32.totalorder %s32_s28, %s1350_s7  ;;  %p1356_p9 = scmp.lt.s32.totalorder %s1350_s7, %s1350_s7 }
  0x54   :  { %p1357_p10 = por %p1356_p9, %p1355_p8 }
  0x56   :  { %p1358_p11 = pnand %p1357_p10, %p1351_p7 }
  0x58   :  { %1361 = shalt.err (!%p1358_p11)
}
  0x59   :  { %37 = dma.hbm_to_vmem [thread:$0]  %s1795_s0, 256, %s32_s28, [#allocation6], %s1486_s12, %s1486_s12, %s1487_s13  }
  0x5a   :  { %s1362_s23 = scalar_lea.hbm %s1797_s2, 128 }
  0x5b   :  { %p1363_p12 = scmp.ne.s32.totalorder %s1797_s2, %s1362_s23  ;;  %p1366_p13 = scmp.lt.u32.totalorder %s1362_s23, %s1797_s2 }
  0x5d   :  { %p1368_p0 = pnand %p1366_p13, %p1363_p12 }
  0x5f   :  { %1371 = shalt.err (!%p1368_p0)
}
  0x60   :  { %s1372_s5 = scalar_lea.vmem %s57_s30, 128  ;;  %p1377_p2 = scmp.lt.s32.totalorder %s57_s30, %s57_s30 }
  0x61   :  { %p1373_p1 = scmp.ne.s32.totalorder %s57_s30, %s1372_s5  ;;  %p1378_p3 = scmp.lt.s32.totalorder %s1372_s5, %s1372_s5 }
  0x63   :  { %p1379_p4 = por %p1378_p3, %p1377_p2 }
  0x65   :  { %p1380_p5 = pnand %p1379_p4, %p1373_p1 }
  0x67   :  { %1383 = shalt.err (!%p1380_p5)
}
  0x68   :  { %59 = dma.hbm_to_vmem [thread:$0]  %s1797_s2, 128, %s57_s30, [#allocation9]  }
  0x69   :  { %s1492_s27 = smov [#allocation13]   ;;  %s1493_s29 = smov [#allocation16]  }
  0x6a   :  { %s76_s28 = sshll.u32 %s1492_s27, 4  ;;  %s96_s14 = sshll.u32 %s1493_s29, 4  ;;  %s77_s28 = int_to_ptr.vmem [resolvable:$true] %s76_s28  ;;  %s97_s14 = int_to_ptr.vmem [resolvable:$true] %s96_s14 }
  0x6b   :  { %s1384_s17 = scalar_lea.hbm %s1799_s4, 16 }
  0x6c   :  { %p1385_p6 = scmp.ne.s32.totalorder %s1799_s4, %s1384_s17  ;;  %p1388_p7 = scmp.lt.u32.totalorder %s1384_s17, %s1799_s4 }
  0x6e   :  { %p1390_p8 = pnand %p1388_p7, %p1385_p6 }
  0x70   :  { %1393 = shalt.err (!%p1390_p8)
}
  0x71   :  { %s1394_s2 = scalar_lea.vmem %s77_s28, 16  ;;  %s1398_s30 = scalar_lea.vmem %s77_s28, 32 }
  0x72   :  { %p1395_p9 = scmp.ne.s32.totalorder %s77_s28, %s1394_s2  ;;  %p1399_p10 = scmp.lt.s32.totalorder %s77_s28, %s77_s28 }
  0x73   :  { %p1400_p11 = scmp.lt.s32.totalorder %s1398_s30, %s1394_s2 }
  0x75   :  { %p1401_p12 = por %p1400_p11, %p1399_p10 }
  0x77   :  { %p1402_p13 = pnand %p1401_p12, %p1395_p9 }
  0x79   :  { %1405 = shalt.err (!%p1402_p13)
}
  0x7a   :  { %79 = dma.hbm_to_vmem [thread:$0]  %s1799_s4, 16, %s77_s28, [#allocation12]  }
  0x7b   :  { %s1406_s23 = scalar_lea.hbm %s1801_s6, 128 }
  0x7c   :  { %p1407_p0 = scmp.ne.s32.totalorder %s1801_s6, %s1406_s23  ;;  %p1410_p1 = scmp.lt.u32.totalorder %s1406_s23, %s1801_s6 }
  0x7e   :  { %p1412_p2 = pnand %p1410_p1, %p1407_p0 }
  0x80   :  { %1415 = shalt.err (!%p1412_p2)
}
  0x81   :  { %s1416_s5 = scalar_lea.vmem %s97_s14, 128  ;;  %p1421_p4 = scmp.lt.s32.totalorder %s97_s14, %s97_s14 }
  0x82   :  { %p1417_p3 = scmp.ne.s32.totalorder %s97_s14, %s1416_s5  ;;  %p1422_p5 = scmp.lt.s32.totalorder %s1416_s5, %s1416_s5 }
  0x84   :  { %p1423_p6 = por %p1422_p5, %p1421_p4 }
  0x86   :  { %p1424_p7 = pnand %p1423_p6, %p1417_p3 }
  0x88   :  { %1427 = shalt.err (!%p1424_p7)
}
  0x89   :  { %99 = dma.hbm_to_vmem [thread:$0]  %s1801_s6, 128, %s97_s14, [#allocation15]  }
  0x8a   :  { %s1494_s26 = smov [#allocation19]   ;;  %s1428_s15 = scalar_lea.hbm %s1803_s8, 128 }
  0x8b   :  { %s116_s27 = sshll.u32 %s1494_s26, 4  ;;  %p1429_p8 = scmp.ne.s32.totalorder %s1803_s8, %s1428_s15  ;;  %s117_s27 = int_to_ptr.vmem [resolvable:$true] %s116_s27 }
  0x8c   :  { %p1432_p9 = scmp.lt.u32.totalorder %s1428_s15, %s1803_s8 }
  0x8e   :  { %p1434_p10 = pnand %p1432_p9, %p1429_p8 }
  0x90   :  { %1437 = shalt.err (!%p1434_p10)
}
  0x91   :  { %s1438_s18 = scalar_lea.vmem %s117_s27, 128  ;;  %p1443_p12 = scmp.lt.s32.totalorder %s117_s27, %s117_s27 }
  0x92   :  { %p1439_p11 = scmp.ne.s32.totalorder %s117_s27, %s1438_s18  ;;  %p1444_p13 = scmp.lt.s32.totalorder %s1438_s18, %s1438_s18 }
  0x94   :  { %p1445_p0 = por %p1444_p13, %p1443_p12 }
  0x96   :  { %p1446_p1 = pnand %p1445_p0, %p1439_p11 }
  0x98   :  { %1449 = shalt.err (!%p1446_p1)
}
  0x99   :  { %119 = dma.hbm_to_vmem [thread:$0]  %s1803_s8, 128, %s117_s27, [#allocation18]  }
  0x9a   :  { %1472 = dma.done.wait [#allocation6], 256  }
  0x9b   :  { %1473 = vsyncadd [#allocation6], 4294967040 }
  0x9c   :  { %1474 = dma.done.wait [#allocation9], 384  }
  0x9d   :  { %1475 = vsyncadd [#allocation9], 4294966912 }
  0x9e   :  { %1476 = dma.done.wait [#allocation12], 144  }
  0x9f   :  { %1477 = vsyncadd [#allocation12], 4294967152 }
  0xa0   :  { %1478 = dma.done.wait [#allocation15], 256  }
  0xa1   :  { %1479 = vsyncadd [#allocation15], 4294967040 }
  0xa2   :  { %1480 = dma.done.wait [#allocation18], 256  }
  0xa3   :  { %1481 = vsyncadd [#allocation18], 4294967040  ;;  %v1495_v2 = vmov 0.0   ;;  %vm161_vm0 = vcmask 1043456   ;;  %v1681_v3 = vld [vmem:[#allocation8] sm:$0xff]  ;;  %v1683_v4 = vld [vmem:[#allocation8 + $0x8] sm:$0xff] }
  0xa4   :  { %311 = vmatprep.mubr.f32.mxu1 %v1495_v2  ;;  %230 = vmatprep.mubr.f32.mxu0 %v1495_v2  ;;  %v239_v5 = vcombine.high %v1681_v3, %v1681_v3  ;;  %v1689_v6 = vcombine.high %v1683_v4, %v1683_v4  ;;  %v1691_v7 = vld [vmem:[#allocation5] sm:$0xff]  ;;  %v1693_v8 = vld [vmem:[#allocation5 + $0x8] sm:$0xff]  ;;  %vm157_vm1 = vcmask 31744   ;;  %v1496_v37 = vmov 0   ;;  %v516_v1 = vld [vmem:[#allocation14] sm:$0xff]  ;;  %s1498_s8 = smov [#allocation20]  }
  0xa5   :  { %v1695_v9 = vld [vmem:[#allocation11] sm:$0xff]  ;;  %v156_v10 = vcombine.high %v1691_v7, %v1691_v7  ;;  %v1705_v11 = vcombine.high %v1693_v8, %v1693_v8  ;;  %v1711_v12 = vld [vmem:[#allocation10] sm:$0xff]  ;;  %1232 = vset.pattern.permute.xlu0 %v1496_v37  ;;  %1233 = vset.pattern.permute.xlu1 %v1496_v37  ;;  %vm711_vm2 = vcmask 64512   ;;  %vm809_vm3 = vcmask 1040384   ;;  %s1171_s7 = sshll.u32 %s1498_s8, 4  ;;  %s1172_s7 = int_to_ptr.vmem [resolvable:$true] %s1171_s7 }
  0xa6   :  { %1190 = vmatprep.subr.msk.mxu1 %vm161_vm0, %v239_v5  ;;  %v529_v62 = vld [vmem:[#allocation17] sm:$0xff]  ;;  %s1450_s2 = scalar_lea.vmem %s1172_s7, 256  ;;  %p1455_p3 = scmp.lt.s32.totalorder %s1172_s7, %s1172_s7 }
  0xa7   :  { %1191 = vmatpush1.msk.msra.mxu1 %vm161_vm0, %v1681_v3  ;;  %1187 = vmatprep.subr.msk.mxu0 %vm161_vm0, %v156_v10  ;;  %p1451_p2 = scmp.ne.s32.totalorder %s1172_s7, %s1450_s2  ;;  %p1456_p4 = scmp.lt.s32.totalorder %s1450_s2, %s1450_s2 }
  0xa8   :  { %1192 = vmatmul.mubr.msk.f32.vlgmr.msra.gmra.mrb[0].mxu1 %vm157_vm1, %v1695_v9  ;;  %1196 = vmatprep.subr.msk.mxu1 %vm161_vm0, %v1689_v6 }
  0xa9   :  { %1197 = vmatpush1.msk.msra.mxu1 %vm161_vm0, %v1683_v4  ;;  %489 = vmatprep.mubr.f32.mxu1 %v1495_v2  ;;  %p1457_p5 = por %p1456_p4, %p1455_p3 }
  0xaa   :  { %1188 = vmatpush1.msk.msra.mxu0 %vm161_vm0, %v1691_v7 }
  0xab   :  { %1189 = vmatmul.mubr.msk.f32.vlgmr.msra.gmra.mrb[0].mxu0 %vm157_vm1, %v1711_v12  ;;  %1193 = vmatprep.subr.msk.mxu0 %vm161_vm0, %v1705_v11  ;;  %p1458_p6 = pnand %p1457_p5, %p1451_p2 }
  0xac   :  { %1198 = vmatmul.mubr.msk.f32.vlgmr.msra.gmra.mrb[2].mxu1 %vm157_vm1, %v1695_v9  ;;  %1194 = vmatpush1.msk.msra.mxu0 %vm161_vm0, %v1693_v8 }
  0xad   :  { %410 = vmatprep.mubr.f32.mxu0 %v1495_v2  ;;  %1199 = vmatprep.subr.msk.mxu0 %vm161_vm0, %v239_v5 }
  0xae   :  { %779 = vmatprep.mubr.f32.mxu1 %v1495_v2 }
  0xaf   :  { %1195 = vmatmul.mubr.msk.f32.vlgmr.msra.gmra.mrb[2].mxu0 %vm157_vm1, %v1711_v12 }
  0xb0   :  { %1200 = vmatpush1.msk.msra.mxu0 %vm161_vm0, %v1681_v3  ;;  %621 = vmatprep.mubr.f32.mxu0 %v1495_v2 }
  0xb1   :  { %1202 = vmatprep.subr.msk.mxu0 %vm161_vm0, %v156_v10 }
 0x17b   :  { %v313_v13 = vpop.f32.mrb[0].mxu1 }
 0x17c   :  { %v332_v14 = vmul.f32 %v313_v13, %v313_v13  ;;  %v315_v15 = vpop.f32.mrb[1].mxu1 }
 0x17d   :  { %v333_v16 = vmul.f32 %v315_v15, %v315_v15  ;;  %v328_v17 = vadd.f32 %v315_v15, %v313_v13  ;;  %v530_v15 = vld [vmem:[#allocation19] sm:$0xff] }
 0x17e   :  { %v232_v18 = vpop.f32.mrb[0].mxu0 }
 0x17f   :  { %v491_v19 = vpop.f32.mrb[2].mxu1  ;;  %329 = vadd.xlane.f32.xlu0 %v328_v17  ;;  %v322_v20 = vmul.f32 %v232_v18, %v232_v18  ;;  %v334_v21 = vadd.f32 %v333_v16, %v332_v14  ;;  %v234_v22 = vpop.f32.mrb[1].mxu0  ;;  %v517_v14 = vld [vmem:[#allocation16] sm:$0xff] }
 0x180   :  { %v510_v23 = vmul.f32 %v491_v19, %v491_v19  ;;  %v493_v24 = vpop.f32.mrb[3].mxu1  ;;  %v323_v25 = vmul.f32 %v234_v22, %v234_v22  ;;  %v318_v26 = vadd.f32 %v234_v22, %v232_v18 }
 0x181   :  { %v511_v27 = vmul.f32 %v493_v24, %v493_v24  ;;  %335 = vadd.xlane.f32.xlu1 %v334_v21  ;;  %v506_v28 = vadd.f32 %v493_v24, %v491_v19 }
 0x182   :  { %v412_v29 = vpop.f32.mrb[2].mxu0  ;;  %v324_v30 = vadd.f32 %v323_v25, %v322_v20 }
 0x183   :  { %507 = vadd.xlane.f32.xlu0 %v506_v28  ;;  %v500_v31 = vmul.f32 %v412_v29, %v412_v29  ;;  %v512_v32 = vadd.f32 %v511_v27, %v510_v23  ;;  %v414_v33 = vpop.f32.mrb[3].mxu0 }
 0x184   :  { %v501_v34 = vmul.f32 %v414_v33, %v414_v33  ;;  %v496_v35 = vadd.f32 %v414_v33, %v412_v29 }
 0x185   :  { %513 = vadd.xlane.f32.xlu1 %v512_v32 }
 0x186   :  { %v502_v36 = vadd.f32 %v501_v34, %v500_v31 }
 0x187   :  { %319 = vadd.xlane.f32.xlu0 %v318_v26 }
 0x189   :  { %497 = vadd.xlane.f32.xlu1 %v496_v35 }
 0x18b   :  { %325 = vadd.xlane.f32.xlu0 %v324_v30  ;;  %v153_v30 = vld [vmem:[#allocation13] sm:$0x1] }
 0x18d   :  { %503 = vadd.xlane.f32.xlu1 %v502_v36 }
 0x20c   :  { %v330_v38 = vpop.xlane.xlu0 %329 }
 0x20e   :  { %v336_v39 = vpop.xlane.xlu1 %335 }
 0x210   :  { %v508_v40 = vpop.xlane.xlu0 %507 }
 0x211   :  { %v509_v41 = vadd.f32 %v508_v40, %v330_v38 }
 0x212   :  { %v514_v42 = vpop.xlane.xlu1 %513 }
 0x213   :  { %v531_v43 = vmul.f32 0.001953125, %v509_v41  ;;  %v515_v44 = vadd.f32 %v514_v42, %v336_v39 }
 0x214   :  { %v320_v45 = vpop.xlane.xlu0 %319 }
 0x215   :  { %v533_v46 = vmul.f32 %v531_v43, %v531_v43  ;;  %v532_v47 = vmul.f32 0.001953125, %v515_v44 }
 0x216   :  { %v498_v48 = vpop.xlane.xlu1 %497 }
 0x217   :  { %v534_v49 = vsub.f32 %v532_v47, %v533_v46  ;;  %v499_v50 = vadd.f32 %v498_v48, %v320_v45 }
 0x218   :  { %v326_v53 = vpop.xlane.xlu0 %325 }
 0x219   :  { %v535_v51 = vmax.f32 %v534_v49, 0.0  ;;  %v519_v52 = vmul.f32 0.001953125, %v499_v50 }
 0x21a   :  { %v504_v54 = vpop.xlane.xlu1 %503 }
 0x21b   :  { %v536_v55 = vadd.f32 1e-05, %v535_v51  ;;  %v505_v56 = vadd.f32 %v504_v54, %v326_v53  ;;  %v521_v57 = vmul.f32 %v519_v52, %v519_v52 }
 0x21d   :  { %1238 = vrsqrt.f32 %v536_v55  ;;  %v520_v58 = vmul.f32 0.001953125, %v505_v56 }
 0x21f   :  { %v522_v59 = vsub.f32 %v520_v58, %v521_v57 }
 0x221   :  { %v523_v60 = vmax.f32 %v522_v59, 0.0 }
 0x223   :  { %v524_v61 = vadd.f32 1e-05, %v523_v60 }
 0x225   :  { %1240 = vrsqrt.f32 %v524_v61 }
 0x227   :  { %v1239_v63 = vpop.eup %1238 }
 0x228   :  { %v538_v0 = vmul.f32 %v1239_v63, %v529_v62 }
 0x22a   :  { %549 = vperm.xlu0 %1232, %v538_v0   ;;  %v539_v10 = vmul.f32 %v538_v0, %v531_v43 }
 0x22c   :  { %v540_v18 = vsub.f32 %v530_v15, %v539_v10 }
 0x22f   :  { %v1241_v5 = vpop.eup %1240 }
 0x230   :  { %v526_v13 = vmul.f32 %v1241_v5, %v516_v1 }
 0x232   :  { %543 = vperm.xlu1 %1233, %v526_v13   ;;  %v527_v16 = vmul.f32 %v526_v13, %v519_v52 }
 0x234   :  { %v528_v17 = vsub.f32 %v517_v14, %v527_v16 }
 0x236   :  { %v553_v19 = vadd.f32 %v540_v18, %v528_v17 }
 0x238   :  { %704 = vperm.xlu1 %1233, %v553_v19  }
 0x2a9   :  { %v550_v20 = vpop.permute.xlu0 %549 }
 0x2aa   :  { %v552_v21 = vmul.f32 %v550_v20, %v1695_v9 }
 0x2ac   :  { %1201 = vmatmul.mubr.msk.f32.vlgmr.msra.gmra.mrb[4].mxu0 %vm157_vm1, %v552_v21 }
 0x2ad   :  { %1203 = vmatpush1.msk.msra.mxu0 %vm161_vm0, %v1691_v7  ;;  %695 = vmatprep.mubr.f32.mxu0 %v1495_v2  ;;  %v1497_v7 = vmov 1966171168  }
 0x2b1   :  { %v544_v22 = vpop.permute.xlu1 %543 }
 0x2b2   :  { %v546_v23 = vmul.f32 %v544_v22, %v1711_v12  ;;  %v790_v12 = vunpack.c.l.s4 %v1497_v7 }
 0x2b4   :  { %1204 = vmatmul.mubr.msk.f32.vlgmr.msra.gmra.mrb[4].mxu0 %vm157_vm1, %v546_v23  ;;  %v791_v31 = vunpack.c.0.s8 %v790_v12 }
 0x2b5   :  { %1048 = vmatprep.mubr.f32.mxu0 %v1495_v2 }
 0x2b7   :  { %v705_v24 = vpop.permute.xlu1 %704 }
 0x387   :  { %v697_v25 = vpop.f32.mrb[4].mxu0 }
 0x388   :  { %v707_v26 = vadd.f32 %v705_v24, %v697_v25  ;;  %v699_v27 = vpop.f32.mrb[5].mxu0 }
 0x389   :  { %v708_v28 = vadd.f32 %v705_v24, %v699_v27 }
 0x38a   :  { %v709_v29 = vmax.f32 %v707_v26, 0.0 }
 0x38b   :  { %v710_v9 = vmax.f32 %v708_v28, 0.0 }
 0x38d   :  { %715 = vmatprep.subr.mxu1 %v710_v9 }
 0x38e   :  { %716 = vmatpush1.msra.mxu1 %v709_v29 }
 0x38f   :  { %1205 = vmatmul.mubr.msk.f32.vlgmr.msra.gmra.mrb[4].mxu1 %vm711_vm2, %v153_v30  ;;  %1206 = vmatprep.subr.msk.mxu1 %vm161_vm0, %v1689_v6  ;;  %v792_v6 = vlaneseq }
 0x390   :  { %1207 = vmatpush1.msk.msra.mxu1 %vm161_vm0, %v1683_v4  ;;  %896 = vmatprep.mubr.f32.mxu1 %v1495_v2 }
 0x391   :  { %1209 = vmatprep.subr.msk.mxu1 %vm161_vm0, %v1705_v11  ;;  %v1756_v32 = vshrl.u32 %v792_v6, 7  ;;  %vm1763_vm4 = vcmp.lt.s32.totalorder %v792_v6, 256 }
 0x393   :  { %1208 = vmatmul.mubr.msk.f32.vlgmr.msra.gmra.mrb[6].mxu1 %vm157_vm1, %v552_v21  ;;  %v794_v34 = vsub.s32 %v791_v31, %v1756_v32  ;;  %v1089_v21 = vld [vmem:[#allocation3] sm:$0x1]  ;;  %v1109_v27 = vsub.s32 0, %v1756_v32 }
 0x394   :  { %1210 = vmatpush1.msk.msra.mxu1 %vm161_vm0, %v1693_v8  ;;  %973 = vmatprep.mubr.f32.mxu1 %v1495_v2 }
 0x39b   :  { %1211 = vmatmul.mubr.msk.f32.vlgmr.msra.gmra.mrb[6].mxu1 %vm157_vm1, %v546_v23 }
 0x462   :  { %v781_v33 = vpop.f32.mrb[4].mxu1 }
 0x463   :  { %v816_v11 = vmul.f32 %v781_v33, %v781_v33  ;;  %v783_v35 = vpop.f32.mrb[5].mxu1  ;;  %v810_v36 = vsel %vm809_vm3, %v781_v33, 0.0 }
 0x464   :  { %v788_v37 = vcombine.low %v781_v33, %v783_v35  ;;  %v817_v8 = vmul.f32 %v783_v35, %v783_v35  ;;  %v811_v2 = vsel %vm809_vm3, %v783_v35, 0.0 }
 0x465   :  { %v812_v38 = vadd.f32 %v811_v2, %v810_v36  ;;  %v818_v39 = vsel %vm809_vm3, %v816_v11, 0.0 }
 0x466   :  { %v795_v40 = vrot.slane %v788_v37, %v794_v34  ;;  %v819_v41 = vsel %vm809_vm3, %v817_v8, 0.0 }
 0x467   :  { %813 = vadd.xlane.f32.xlu1 %v812_v38  ;;  %v820_v43 = vadd.f32 %v819_v41, %v818_v39 }
 0x468   :  { %v802_v44 = vrot.slane %v795_v40, %v794_v34  ;;  %v1136_v40 = vsub.s32 1, %v1756_v32 }
 0x46a   :  { %808 = vst.msk [vmem:[#allocation2] sm:$0x3] %vm1763_vm4, %v802_v44 }
 0x46b   :  { %821 = vadd.xlane.f32.xlu1 %v820_v43 }
 0x46e   :  { %v975_v45 = vpop.f32.mrb[6].mxu1 }
 0x46f   :  { %v980_v46 = vadd.f32 %v975_v45, %v705_v24  ;;  %v977_v47 = vpop.f32.mrb[7].mxu1 }
 0x470   :  { %v981_v48 = vadd.f32 %v977_v47, %v705_v24  ;;  %v1090_v24 = vld [vmem:[#allocation4] sm:$0x1] }
 0x471   :  { %v982_v50 = vmax.f32 %v980_v46, 0.0 }
 0x472   :  { %v983_v49 = vmax.f32 %v981_v48, 0.0 }
 0x474   :  { %984 = vmatprep.subr.mxu0 %v983_v49 }
 0x475   :  { %985 = vmatpush1.msra.mxu0 %v982_v50 }
 0x476   :  { %1212 = vmatmul.mubr.msk.f32.vlgmr.msra.gmra.mrb[6].mxu0 %vm711_vm2, %v153_v30  ;;  %v1101_v30 = vld [vmem:[#allocation2] sm:$0x3] }
 0x4f4   :  { %v814_v0 = vpop.xlane.xlu1 %813 }
 0x4f8   :  { %v822_v1 = vpop.xlane.xlu1 %821 }
 0x549   :  { %v1050_v51 = vpop.f32.mrb[6].mxu0 }
 0x54a   :  { %v1081_v52 = vmul.f32 %v1050_v51, %v1050_v51  ;;  %v1052_v53 = vpop.f32.mrb[7].mxu0  ;;  %v1075_v54 = vsel %vm809_vm3, %v1050_v51, 0.0 }
 0x54b   :  { %v1057_v55 = vcombine.low %v1050_v51, %v1052_v53  ;;  %v1076_v56 = vsel %vm809_vm3, %v1052_v53, 0.0  ;;  %v1082_v57 = vmul.f32 %v1052_v53, %v1052_v53 }
 0x54c   :  { %v1077_v58 = vadd.f32 %v1076_v56, %v1075_v54  ;;  %v1083_v59 = vsel %vm809_vm3, %v1081_v52, 0.0 }
 0x54d   :  { %v1064_v60 = vrot.slane %v1057_v55, %v794_v34  ;;  %v1084_v61 = vsel %vm809_vm3, %v1082_v57, 0.0 }
 0x54e   :  { %1078 = vadd.xlane.f32.xlu0 %v1077_v58  ;;  %v1085_v62 = vadd.f32 %v1084_v61, %v1083_v59 }
 0x54f   :  { %v1071_v63 = vrot.slane %v1064_v60, %v794_v34 }
 0x550   :  { %1086 = vadd.xlane.f32.xlu1 %v1085_v62 }
 0x551   :  { %1074 = vst.msk [vmem:[#allocation2 + $0x2] sm:$0x3] %vm1763_vm4, %v1071_v63 }
 0x558   :  { %v1142_v29 = vld [vmem:[#allocation2 + $0x2] sm:$0x3] }
 0x5db   :  { %v1079_v5 = vpop.xlane.xlu0 %1078 }
 0x5dc   :  { %v1080_v10 = vadd.f32 %v1079_v5, %v814_v0 }
 0x5dd   :  { %v1087_v13 = vpop.xlane.xlu1 %1086 }
 0x5de   :  { %v1091_v14 = vmul.f32 0.001953125, %v1080_v10  ;;  %v1088_v15 = vadd.f32 %v1087_v13, %v822_v1 }
 0x5e0   :  { %v1093_v16 = vmul.f32 %v1091_v14, %v1091_v14  ;;  %v1092_v17 = vmul.f32 0.001953125, %v1088_v15 }
 0x5e2   :  { %v1094_v18 = vsub.f32 %v1092_v17, %v1093_v16 }
 0x5e4   :  { %v1095_v19 = vmax.f32 %v1094_v18, 0.0 }
 0x5e6   :  { %v1096_v20 = vadd.f32 1e-05, %v1095_v19 }
 0x5e8   :  { %1242 = vrsqrt.f32 %v1096_v20 }
 0x5f2   :  { %v1243_v22 = vpop.eup %1242 }
 0x5f3   :  { %v1098_v23 = vmul.f32 %v1243_v22, %v1089_v21 }
 0x5f5   :  { %1104 = vperm.xlu1 %1233, %v1098_v23   ;;  %v1099_v25 = vmul.f32 %v1098_v23, %v1091_v14 }
 0x5f7   :  { %v1100_v26 = vsub.f32 %v1090_v24, %v1099_v25 }
 0x5f9   :  { %1114 = vperm.xlu0 %1232, %v1100_v26  }
 0x674   :  { %v1105_v28 = vpop.permute.xlu1 %1104 }
 0x675   :  { %v1110_v9 = vrot.slane %v1105_v28, %v1109_v27 }
 0x677   :  { %v1111_v12 = vmul.f32 %v1110_v9, %v1101_v30  ;;  %v1143_v6 = vmul.f32 %v1142_v29, %v1110_v9 }
 0x678   :  { %v1115_v7 = vpop.permute.xlu0 %1114 }
 0x679   :  { %v1120_v31 = vrot.slane %v1115_v7, %v1109_v27 }
 0x67b   :  { %v1121_v33 = vadd.f32 %v1120_v31, %v1111_v12  ;;  %v1144_v34 = vadd.f32 %v1143_v6, %v1120_v31 }
 0x67d   :  { %v1122_v11 = vsub.f32 0.0, %v1121_v33  ;;  %v1145_v35 = vsub.f32 0.0, %v1144_v34 }
 0x67f   :  { %v1123_v36 = vmul.f32 1.442695, %v1122_v11  ;;  %v1146_v37 = vmul.f32 1.442695, %v1145_v35 }
 0x681   :  { %1244 = vpow2.f32 %v1123_v36 }
 0x682   :  { %1246 = vpow2.f32 %v1146_v37 }
 0x68b   :  { %v1245_v8 = vpop.eup %1244 }
 0x68c   :  { %v1247_v2 = vpop.eup %1246  ;;  %v1125_v38 = vadd.f32 1.0, %v1245_v8 }
 0x68d   :  { %v1148_v39 = vadd.f32 1.0, %v1247_v2 }
 0x68e   :  { %1248 = vrcp.f32 %v1125_v38 }
 0x68f   :  { %1250 = vrcp.f32 %v1148_v39 }
 0x698   :  { %v1249_v41 = vpop.eup %1248 }
 0x699   :  { %v1251_v42 = vpop.eup %1250  ;;  %v1133_v43 = vrot.slane %v1249_v41, %v1109_v27  ;;  %v1137_v44 = vrot.slane %v1249_v41, %v1136_v40 }
 0x69a   :  { %v1156_v45 = vrot.slane %v1251_v42, %v1109_v27  ;;  %v1160_v46 = vrot.slane %v1251_v42, %v1136_v40 }
 0x69b   :  { %v1138_v47 = vcombine.low %v1133_v43, %v1137_v44 }
 0x69c   :  { %v1161_v48 = vcombine.low %v1156_v45, %v1160_v46 }
 0x69d   :  { %v1140_v49 = vmul.f32 %v1138_v47, %v1681_v3 }
 0x69e   :  { %v1163_v50 = vmul.f32 %v1161_v48, %v1683_v4 }
 0x69f   :  { %1141 = vst [vmem:[#allocation20] sm:$0xff] %v1140_v49 }
 0x6a0   :  { %1165 = vst [vmem:[#allocation20 + $0x8] sm:$0xff] %v1163_v50 }
 0x6a1   :  { %1461 = shalt.err (!%p1458_p6)
}
 0x6a2   :  { %s1462_s19 = scalar_lea.hbm %s1805_s11, 256 }
 0x6a3   :  { %p1463_p7 = scmp.ne.s32.totalorder %s1805_s11, %s1462_s19  ;;  %p1466_p8 = scmp.lt.u32.totalorder %s1462_s19, %s1805_s11 }
 0x6a5   :  { %p1468_p9 = pnand %p1466_p8, %p1463_p7 }
 0x6a7   :  { %1471 = shalt.err (!%p1468_p9)
}
 0x6a8   :  { %1177 = dma.vmem_to_hbm [thread:$0]  %s1172_s7, 256, %s1805_s11, [#allocation7], %s1486_s12, %s1486_s12, %s1487_s13  }
 0x6a9   :  { %1482 = dma.done.wait [#allocation7], 256  }
 0x6aa   :  { %1483 = vsyncadd [#allocation7], 4294967040 }
 0x6ab   :  { %1181 = vsyncpa [#allocation6], 1 }
 0x6ac   :  { %1182 = vsyncpa [#allocation9], 1 }
 0x6ad   :  { %1183 = vsyncpa [#allocation12], 1 }
 0x6ae   :  { %1184 = vsyncpa [#allocation15], 1 }
 0x6af   :  { %1185 = vsyncpa [#allocation18], 1 }
 0x6b0   :  { %1186 = vsyncpa [#allocation7], 1 }

</bundles_post_ra>
